<compile_context>
chip_gen: v6e
topology: v6e:2x2x1
jax: 0.10.0
libtpu: 0.0.40
codegen_flags: <defaults>
</compile_context>

<pallas_src>
import jax
import jax.numpy as jnp
from jax.experimental import pallas as pl
from jax.experimental.pallas import tpu as pltpu

B, D_IN, HID, PROJ = 8, 32, 64, 128
LAMBD = 5e-3
BN_EPS = 1e-5

# TODO(synk): the PyTorch module accepts arbitrary encoder/projector sub-nets;
# only this Linear+ReLU / Linear instantiation is implemented in-kernel.


def barlow_twins_kernel(y1_ref, y2_ref, w1_ref, b1_ref, w2_ref, b2_ref, loss_ref):
    """Fused encoder + projector + per-view BN + Barlow loss.

    y1_ref, y2_ref : [B, D_IN]                 the two augmented views
    w1_ref, b1_ref : [D_IN, HID], [1, HID]     encoder Linear weight / bias
    w2_ref, b2_ref : [HID, PROJ], [1, PROJ]    projector Linear weight / bias
    loss_ref       : [1, 1] VMEM output (scalar loss)
    """
    # Stack both views along the sublane axis; each view is exactly 8 rows, so
    # the concat and the later z[:B]/z[B:] splits land on vreg boundaries.
    y = jnp.concatenate([y1_ref[...], y2_ref[...]], axis=0)            # [2B, D_IN]

    # --- encoder (Linear + ReLU) + projector (Linear), both views at once ---
    h = jnp.maximum(
        jnp.dot(y, w1_ref[...], preferred_element_type=jnp.float32)
        + b1_ref[...], 0.0)                                            # [2B, HID]
    z = (jnp.dot(h, w2_ref[...], preferred_element_type=jnp.float32)
         + b2_ref[...])                                                # [2B, PROJ]

    z1, z2 = z[:B], z[B:]                                              # vreg-aligned

    # --- per-view BatchNorm1d(PROJ, affine=False), training-mode semantics ---
    def bn(x):
        # One-pass stats: the two cross-sublane reductions are independent.
        mean = jnp.mean(x, axis=0, keepdims=True)                      # [1, PROJ]
        ex2 = jnp.mean(x * x, axis=0, keepdims=True)                   # [1, PROJ]
        var = ex2 - mean * mean
        return (x - mean) * jax.lax.rsqrt(var + BN_EPS)

    z1n, z2n = bn(z1), bn(z2)                                          # [B, PROJ]

    # --- c = z1n @ z2n.T / B   (torch.mm(z1_norm, z2_norm.t()) / batch_size) ---
    c = jax.lax.dot_general(
        z1n, z2n, (((1,), (1,)), ((), ())),
        preferred_element_type=jnp.float32) * (1.0 / B)                # [B, B]

    # off_diagonal((c - I)^2).sum() == sum(c^2) - sum(diag(c)^2); diag(c) is the
    # row-wise dot of z1n, z2n -> no eye/iota mask.  Everything stays 2-D.
    diag = jnp.sum(z1n * z2n, axis=1, keepdims=True) * (1.0 / B)       # [B, 1]
    row_cc = jnp.sum(c * c, axis=1, keepdims=True)                     # [B, 1]
    off_rows = row_cc - diag * diag                                    # [B, 1]
    loss_ref[...] = LAMBD * jnp.sum(off_rows, axis=0, keepdims=True)   # [1, 1]


def barlow_twins_forward(y1, y2, w1, b1, w2, b2):
    loss = pl.pallas_call(
        barlow_twins_kernel,
        out_shape=jax.ShapeDtypeStruct((1, 1), jnp.float32),
        in_specs=[pl.BlockSpec(memory_space=pltpu.MemorySpace.VMEM)] * 6,
        out_specs=pl.BlockSpec(memory_space=pltpu.MemorySpace.VMEM),
    )(y1, y2, w1, b1, w2, b2)
    return loss[0, 0]


def reference_forward(y1, y2, w1, b1, w2, b2):
    """Pure-JAX reference with the spec's exact semantics (sanity check)."""
    hp = jax.lax.Precision.HIGHEST

    def mlp(y):
        h = jnp.maximum(jnp.dot(y, w1, precision=hp) + b1, 0.0)
        return jnp.dot(h, w2, precision=hp) + b2

    def bn(z):
        m = jnp.mean(z, axis=0, keepdims=True)
        v = jnp.mean((z - m) ** 2, axis=0, keepdims=True)
        return (z - m) / jnp.sqrt(v + BN_EPS)

    z1n, z2n = bn(mlp(y1)), bn(mlp(y2))
    c = jnp.dot(z1n, z2n.T, precision=hp) / B
    c_diff = (c - jnp.eye(B)) ** 2
    return LAMBD * jnp.sum(c_diff * (1.0 - jnp.eye(B)))


if __name__ == "__main__":
    key = jax.random.PRNGKey(0)
    k1, k2, k3, k4, k5, k6 = jax.random.split(key, 6)

    # deterministic inputs and parameters
    y1 = jax.random.normal(k1, (B, D_IN), dtype=jnp.float32)
    y2 = jax.random.normal(k2, (B, D_IN), dtype=jnp.float32)
    w1 = jax.random.normal(k3, (D_IN, HID), dtype=jnp.float32) * 0.1
    b1 = jax.random.normal(k4, (1, HID), dtype=jnp.float32) * 0.01
    w2 = jax.random.normal(k5, (HID, PROJ), dtype=jnp.float32) * 0.1
    b2 = jax.random.normal(k6, (1, PROJ), dtype=jnp.float32) * 0.01

    loss = barlow_twins_forward(y1, y2, w1, b1, w2, b2)
    jax.block_until_ready(loss)

    ref = reference_forward(y1, y2, w1, b1, w2, b2)
    assert jnp.allclose(loss, ref, rtol=1e-2, atol=1e-4), (loss, ref)

    print("KERNEL_OK")
</pallas_src>

<mosaic_0001>
module attributes {stable_mosaic.version = 11 : i64} {
  func.func @barlow_twins_kernel(%arg0: memref<8x32xf32, #tpu.memory_space<vmem>>, %arg1: memref<8x32xf32, #tpu.memory_space<vmem>>, %arg2: memref<32x64xf32, #tpu.memory_space<vmem>>, %arg3: memref<1x64xf32, #tpu.memory_space<vmem>>, %arg4: memref<64x128xf32, #tpu.memory_space<vmem>>, %arg5: memref<1x128xf32, #tpu.memory_space<vmem>>, %arg6: memref<1x1xf32, #tpu.memory_space<vmem>>) attributes {dimension_semantics = [], scalar_prefetch = 0 : i64, scratch_operands = 0 : i64, tpu.core_type = #tpu.core_type<tc>} {
    %c0 = arith.constant 0 : index
    %c0_0 = arith.constant 0 : index
    %0 = vector.load %arg0[%c0, %c0_0] : memref<8x32xf32, #tpu.memory_space<vmem>>, vector<8x32xf32>
    %c0_1 = arith.constant 0 : index
    %c0_2 = arith.constant 0 : index
    %1 = vector.load %arg1[%c0_1, %c0_2] : memref<8x32xf32, #tpu.memory_space<vmem>>, vector<8x32xf32>
    %2 = tpu.concatenate %0, %1 in 0 : vector<8x32xf32>, vector<8x32xf32> -> vector<16x32xf32>
    %c0_3 = arith.constant 0 : index
    %c0_4 = arith.constant 0 : index
    %3 = vector.load %arg2[%c0_3, %c0_4] : memref<32x64xf32, #tpu.memory_space<vmem>>, vector<32x64xf32>
    %cst = arith.constant dense<0.000000e+00> : vector<16x64xf32>
    %4 = tpu.matmul %2, %3, %cst {dimension_numbers = #tpu.dot_dimension_numbers<[1], [0], [0], [1], [0, 0, 1, 1], [], []>} : vector<16x32xf32>, vector<32x64xf32>, vector<16x64xf32> -> vector<16x64xf32>
    %c0_5 = arith.constant 0 : index
    %c0_6 = arith.constant 0 : index
    %5 = vector.load %arg3[%c0_5, %c0_6] : memref<1x64xf32, #tpu.memory_space<vmem>>, vector<1x64xf32>
    %6 = vector.broadcast %5 : vector<1x64xf32> to vector<16x64xf32>
    %7 = arith.addf %4, %6 : vector<16x64xf32>
    %cst_7 = arith.constant 0.000000e+00 : f32
    %8 = vector.broadcast %cst_7 : f32 to vector<16x64xf32>
    %9 = arith.maximumf %7, %8 : vector<16x64xf32>
    %c0_8 = arith.constant 0 : index
    %c0_9 = arith.constant 0 : index
    %10 = vector.load %arg4[%c0_8, %c0_9] : memref<64x128xf32, #tpu.memory_space<vmem>>, vector<64x128xf32>
    %cst_10 = arith.constant dense<0.000000e+00> : vector<16x128xf32>
    %11 = tpu.matmul %9, %10, %cst_10 {dimension_numbers = #tpu.dot_dimension_numbers<[1], [0], [0], [1], [0, 0, 1, 1], [], []>} : vector<16x64xf32>, vector<64x128xf32>, vector<16x128xf32> -> vector<16x128xf32>
    %c0_11 = arith.constant 0 : index
    %c0_12 = arith.constant 0 : index
    %12 = vector.load %arg5[%c0_11, %c0_12] : memref<1x128xf32, #tpu.memory_space<vmem>>, vector<1x128xf32>
    %13 = vector.broadcast %12 : vector<1x128xf32> to vector<16x128xf32>
    %14 = arith.addf %11, %13 : vector<16x128xf32>
    %15 = vector.extract_strided_slice %14 {offsets = [0, 0], sizes = [8, 128], strides = [1, 1]} : vector<16x128xf32> to vector<8x128xf32>
    %16 = vector.extract_strided_slice %14 {offsets = [8, 0], sizes = [8, 128], strides = [1, 1]} : vector<16x128xf32> to vector<8x128xf32>
    %cst_13 = arith.constant dense<0.000000e+00> : vector<128xf32>
    %17 = vector.multi_reduction <add>, %15, %cst_13 [0] : vector<8x128xf32> to vector<128xf32>
    %18 = vector.shape_cast %17 : vector<128xf32> to vector<1x128xf32>
    %cst_14 = arith.constant 8.000000e+00 : f32
    %19 = vector.broadcast %cst_14 : f32 to vector<1x128xf32>
    %20 = arith.divf %18, %19 : vector<1x128xf32>
    %21 = arith.mulf %15, %15 : vector<8x128xf32>
    %cst_15 = arith.constant dense<0.000000e+00> : vector<128xf32>
    %22 = vector.multi_reduction <add>, %21, %cst_15 [0] : vector<8x128xf32> to vector<128xf32>
    %23 = vector.shape_cast %22 : vector<128xf32> to vector<1x128xf32>
    %cst_16 = arith.constant 8.000000e+00 : f32
    %24 = vector.broadcast %cst_16 : f32 to vector<1x128xf32>
    %25 = arith.divf %23, %24 : vector<1x128xf32>
    %26 = arith.mulf %20, %20 : vector<1x128xf32>
    %27 = arith.subf %25, %26 : vector<1x128xf32>
    %28 = vector.broadcast %20 : vector<1x128xf32> to vector<8x128xf32>
    %29 = arith.subf %15, %28 : vector<8x128xf32>
    %cst_17 = arith.constant 9.99999974E-6 : f32
    %30 = vector.broadcast %cst_17 : f32 to vector<1x128xf32>
    %31 = arith.addf %27, %30 : vector<1x128xf32>
    %32 = math.rsqrt %31 : vector<1x128xf32>
    %33 = vector.broadcast %32 : vector<1x128xf32> to vector<8x128xf32>
    %34 = arith.mulf %29, %33 : vector<8x128xf32>
    %cst_18 = arith.constant dense<0.000000e+00> : vector<128xf32>
    %35 = vector.multi_reduction <add>, %16, %cst_18 [0] : vector<8x128xf32> to vector<128xf32>
    %36 = vector.shape_cast %35 : vector<128xf32> to vector<1x128xf32>
    %cst_19 = arith.constant 8.000000e+00 : f32
    %37 = vector.broadcast %cst_19 : f32 to vector<1x128xf32>
    %38 = arith.divf %36, %37 : vector<1x128xf32>
    %39 = arith.mulf %16, %16 : vector<8x128xf32>
    %cst_20 = arith.constant dense<0.000000e+00> : vector<128xf32>
    %40 = vector.multi_reduction <add>, %39, %cst_20 [0] : vector<8x128xf32> to vector<128xf32>
    %41 = vector.shape_cast %40 : vector<128xf32> to vector<1x128xf32>
    %cst_21 = arith.constant 8.000000e+00 : f32
    %42 = vector.broadcast %cst_21 : f32 to vector<1x128xf32>
    %43 = arith.divf %41, %42 : vector<1x128xf32>
    %44 = arith.mulf %38, %38 : vector<1x128xf32>
    %45 = arith.subf %43, %44 : vector<1x128xf32>
    %46 = vector.broadcast %38 : vector<1x128xf32> to vector<8x128xf32>
    %47 = arith.subf %16, %46 : vector<8x128xf32>
    %cst_22 = arith.constant 9.99999974E-6 : f32
    %48 = vector.broadcast %cst_22 : f32 to vector<1x128xf32>
    %49 = arith.addf %45, %48 : vector<1x128xf32>
    %50 = math.rsqrt %49 : vector<1x128xf32>
    %51 = vector.broadcast %50 : vector<1x128xf32> to vector<8x128xf32>
    %52 = arith.mulf %47, %51 : vector<8x128xf32>
    %cst_23 = arith.constant dense<0.000000e+00> : vector<8x8xf32>
    %53 = tpu.matmul %34, %52, %cst_23 {dimension_numbers = #tpu.dot_dimension_numbers<[1], [1], [0], [0], [0, 0, 1, 0], [], []>} : vector<8x128xf32>, vector<8x128xf32>, vector<8x8xf32> -> vector<8x8xf32>
    %cst_24 = arith.constant 1.250000e-01 : f32
    %54 = vector.broadcast %cst_24 : f32 to vector<8x8xf32>
    %55 = arith.mulf %53, %54 : vector<8x8xf32>
    %56 = arith.mulf %34, %52 : vector<8x128xf32>
    %cst_25 = arith.constant dense<0.000000e+00> : vector<8xf32>
    %57 = vector.multi_reduction <add>, %56, %cst_25 [1] : vector<8x128xf32> to vector<8xf32>
    %58 = vector.shape_cast %57 : vector<8xf32> to vector<8x1xf32>
    %cst_26 = arith.constant 1.250000e-01 : f32
    %59 = vector.broadcast %cst_26 : f32 to vector<8x1xf32>
    %60 = arith.mulf %58, %59 : vector<8x1xf32>
    %61 = arith.mulf %55, %55 : vector<8x8xf32>
    %cst_27 = arith.constant dense<0.000000e+00> : vector<8xf32>
    %62 = vector.multi_reduction <add>, %61, %cst_27 [1] : vector<8x8xf32> to vector<8xf32>
    %63 = vector.shape_cast %62 : vector<8xf32> to vector<8x1xf32>
    %64 = arith.mulf %60, %60 : vector<8x1xf32>
    %65 = arith.subf %63, %64 : vector<8x1xf32>
    %cst_28 = arith.constant dense<0.000000e+00> : vector<1xf32>
    %66 = vector.multi_reduction <add>, %65, %cst_28 [0] : vector<8x1xf32> to vector<1xf32>
    %67 = vector.shape_cast %66 : vector<1xf32> to vector<1x1xf32>
    %cst_29 = arith.constant 5.000000e-03 : f32
    %68 = vector.broadcast %cst_29 : f32 to vector<1x1xf32>
    %69 = arith.mulf %68, %67 : vector<1x1xf32>
    %c0_30 = arith.constant 0 : index
    %c0_31 = arith.constant 0 : index
    %70 = vector.load %arg6[%c0_30, %c0_31] : memref<1x1xf32, #tpu.memory_space<vmem>>, vector<1x1xf32>
    tpu.vector_store %arg6[%c0_30, %c0_31], %69 {strides = array<i32>} : memref<1x1xf32, #tpu.memory_space<vmem>>, vector<1x1xf32>,
    return
  }
}

</mosaic_0001>

<bundles_post_ra>
// kernel: tpu_custom_call.1
= control target key start
LH: loop header
LB: loop body
LE: loop exit
PB: predicated region body
PF: predicated region fallthrough
CT: control target
= control target key end

     0   :  { %11 = vsyncpa [#allocation3], 0  ;;  %s667_s0 = inlined_call_operand.hbm [shape: f32[8,32], index: 0, kind: input, shape index: {}]   ;;  %s668_s1 = inlined_call_operand.hbm [shape: f32[8,32], index: 1, kind: input, shape index: {}]   ;;  %s669_s2 = inlined_call_operand.hbm [shape: f32[32,64], index: 2, kind: input, shape index: {}]   ;;  %s670_s3 = inlined_call_operand.vmem [shape: f32[1,64], index: 3, kind: input, shape index: {}]   ;;  %s671_s4 = inlined_call_operand.hbm [shape: f32[64,128], index: 4, kind: input, shape index: {}]   ;;  %s672_s5 = inlined_call_operand.vmem [shape: f32[1,128], index: 5, kind: input, shape index: {}]   ;;  %s673_s6 = inlined_call_operand.hbm [shape: f32[1,1], index: 6, kind: output, shape index: {}]  }
   0x1   :  { %12 = vsyncpa [#allocation6], 0 }
   0x2   :  { %13 = vsyncpa [#allocation9], 0 }
   0x3   :  { %14 = vsyncpa [#allocation4], 0  ;;  %s600_s21 = smov [#allocation5]   ;;  %s601_s23 = smov [#allocation2]  }
   0x4   :  { %s31_s22 = sshll.u32 %s600_s21, 4  ;;  %s21_s24 = sshll.u32 %s601_s23, 4  ;;  %s32_s22 = int_to_ptr.vmem [resolvable:$true] %s31_s22  ;;  %s22_s24 = int_to_ptr.vmem [resolvable:$true] %s21_s24 }
   0x5   :  { %s500_s25 = scalar_lea.vmem %s32_s22, 128  ;;  %p505_p1 = scmp.lt.s32.totalorder %s32_s22, %s32_s22 }
   0x6   :  { %p501_p0 = scmp.ne.s32.totalorder %s32_s22, %s500_s25  ;;  %p506_p2 = scmp.lt.s32.totalorder %s500_s25, %s500_s25 }
   0x8   :  { %p507_p3 = por %p506_p2, %p505_p1 }
   0xa   :  { %p508_p4 = pnand %p507_p3, %p501_p0 }
   0xc   :  { %511 = shalt.err (!%p508_p4)
}
   0xd   :  { %34 = dma.hbm_to_vmem [thread:$0]  %s668_s1, 128, %s32_s22, [#allocation6]  }
   0xe   :  { %s520_s28 = scalar_lea.vmem %s22_s24, 128  ;;  %p525_p6 = scmp.lt.s32.totalorder %s22_s24, %s22_s24 }
   0xf   :  { %p521_p5 = scmp.ne.s32.totalorder %s22_s24, %s520_s28  ;;  %p526_p7 = scmp.lt.s32.totalorder %s520_s28, %s520_s28 }
  0x11   :  { %p527_p8 = por %p526_p7, %p525_p6 }
  0x13   :  { %p528_p9 = pnand %p527_p8, %p521_p5 }
  0x15   :  { %531 = shalt.err (!%p528_p9)
}
  0x16   :  { %24 = dma.hbm_to_vmem [thread:$0]  %s667_s0, 128, %s22_s24, [#allocation3]  }
  0x17   :  { %s602_s7 = smov [#allocation7]  }
  0x18   :  { %s40_s8 = sshll.u32 %s602_s7, 4  ;;  %s41_s8 = int_to_ptr.vmem [resolvable:$true] %s40_s8 }
  0x19   :  { %s540_s9 = scalar_lea.vmem %s41_s8, 512  ;;  %p545_p11 = scmp.lt.s32.totalorder %s41_s8, %s41_s8 }
  0x1a   :  { %p541_p10 = scmp.ne.s32.totalorder %s41_s8, %s540_s9  ;;  %p546_p12 = scmp.lt.s32.totalorder %s540_s9, %s540_s9 }
  0x1c   :  { %p547_p13 = por %p546_p12, %p545_p11 }
  0x1e   :  { %p548_p0 = pnand %p547_p13, %p541_p10 }
  0x20   :  { %551 = shalt.err (!%p548_p0)
}
  0x21   :  { %s603_s1 = smov 128   ;;  %s604_s10 = smov 8  }
  0x22   :  { %46 = dma.hbm_to_vmem [thread:$0]  %s669_s2, 512, %s41_s8, [#allocation6], %s603_s1, %s603_s1, %s604_s10  }
  0x23   :  { %s605_s13 = smov [#allocation8]  }
  0x24   :  { %s54_s14 = sshll.u32 %s605_s13, 4  ;;  %s55_s14 = int_to_ptr.vmem [resolvable:$true] %s54_s14 }
  0x25   :  { %s560_s0 = scalar_lea.vmem %s55_s14, 1024  ;;  %p565_p2 = scmp.lt.s32.totalorder %s55_s14, %s55_s14 }
  0x26   :  { %p561_p1 = scmp.ne.s32.totalorder %s55_s14, %s560_s0  ;;  %p566_p3 = scmp.lt.s32.totalorder %s560_s0, %s560_s0 }
  0x28   :  { %p567_p4 = por %p566_p3, %p565_p2 }
  0x2a   :  { %p568_p5 = pnand %p567_p4, %p561_p1 }
  0x2c   :  { %571 = shalt.err (!%p568_p5)
}
  0x2d   :  { %60 = dma.hbm_to_vmem [thread:$0]  %s671_s4, 1024, %s55_s14, [#allocation9], %s603_s1, %s603_s1, %s604_s10  }
  0x2e   :  { %592 = dma.done.wait [#allocation3], 128  }
  0x2f   :  { %593 = vsyncadd [#allocation3], 4294967168 }
  0x30   :  { %594 = dma.done.wait [#allocation6], 640  }
  0x31   :  { %595 = vsyncadd [#allocation6], 4294966656 }
  0x32   :  { %596 = dma.done.wait [#allocation9], 1024  }
  0x33   :  { %597 = vsyncadd [#allocation9], 4294966272  ;;  %vm88_vm0 = vcmask 261120   ;;  %v80_v0 = vld [vmem:[#allocation7 + $0x18] sm:$0xff]  ;;  %v79_v1 = vld [vmem:[#allocation7 + $0x10] sm:$0xff]  ;;  %vm187_vm1 = vcmask 523264  }
  0x34   :  { %444 = vmatprep.subr.mxu0 %v80_v0  ;;  %v75_v2 = vld [vmem:[#allocation2] sm:$0xff]  ;;  %v78_v3 = vld [vmem:[#allocation7 + $0x8] sm:$0xff]  ;;  %v179_v4 = vld [vmem:[#allocation8 + $0x38] sm:$0xff]  ;;  %v606_v21 = vmov 0.0   ;;  %vm607_vm2 = vmmov 0   ;;  %vm388_vm3 = vcmask 64512  }
  0x35   :  { %445 = vmatpush3.msra.mxu0 %v80_v0  ;;  %452 = vmatprep.mubr.msk.f32.mxu0 %vm88_vm0, %v75_v2  ;;  %v178_v5 = vld [vmem:[#allocation8 + $0x30] sm:$0xff]  ;;  %v77_v6 = vld [vmem:[#allocation7] sm:$0xff]  ;;  %v177_v7 = vld [vmem:[#allocation8 + $0x28] sm:$0xff]  ;;  %vm401_vm4 = vcmask 0  }
  0x36   :  { %446 = vmatprep.subr.mxu0 %v79_v1  ;;  %455 = vmatprep.subr.mxu1 %v179_v4  ;;  %v76_v8 = vld [vmem:[#allocation5] sm:$0xff]  ;;  %v176_v9 = vld [vmem:[#allocation8 + $0x20] sm:$0xff]  ;;  %v174_v11 = vld [vmem:[#allocation8 + $0x10] sm:$0xff] }
  0x37   :  { %447 = vmatpush3.msra.mxu0 %v79_v1  ;;  %456 = vmatpush3.msra.mxu1 %v179_v4  ;;  %v175_v10 = vld [vmem:[#allocation8 + $0x18] sm:$0xff]  ;;  %v173_v12 = vld [vmem:[#allocation8 + $0x8] sm:$0xff]  ;;  %v172_v13 = vld [vmem:[#allocation8] sm:$0xff] }
  0x38   :  { %448 = vmatprep.subr.mxu0 %v78_v3  ;;  %457 = vmatprep.subr.mxu1 %v178_v5  ;;  %v420_v14 = vld [vmem:[%s670_s3] ss:$0 sm:$0xff]  ;;  %s608_s3 = smov [#allocation10]  }
  0x39   :  { %449 = vmatpush3.msra.mxu0 %v78_v3  ;;  %458 = vmatpush3.msra.mxu1 %v178_v5  ;;  %v423_v22 = vld [vmem:[%s672_s5] ss:$0 sm:$0xff]  ;;  %s409_s5 = sshll.u32 %s608_s3, 4  ;;  %s410_s5 = int_to_ptr.vmem [resolvable:$true] %s409_s5 }
  0x3a   :  { %450 = vmatprep.subr.mxu0 %v77_v6  ;;  %459 = vmatprep.subr.mxu1 %v177_v7  ;;  %s572_s19 = scalar_lea.vmem %s410_s5, 16  ;;  %s576_s20 = scalar_lea.vmem %s410_s5, 32 }
  0x3b   :  { %451 = vmatpush3.msra.mxu0 %v77_v6  ;;  %460 = vmatpush3.msra.mxu1 %v177_v7  ;;  %p573_p6 = scmp.ne.s32.totalorder %s410_s5, %s572_s19  ;;  %p577_p7 = scmp.lt.s32.totalorder %s410_s5, %s410_s5 }
  0x3c   :  { %453 = vmatmul.mubr.msk.f32.vlgmr.msra.gmra.mxu0 %vm88_vm0, %v76_v8  ;;  %461 = vmatprep.subr.mxu1 %v176_v9  ;;  %p578_p8 = scmp.lt.s32.totalorder %s576_s20, %s572_s19 }
  0x3d   :  { %462 = vmatpush3.msra.mxu1 %v176_v9  ;;  %474 = vmatprep.subr.mxu0 %v606_v21 }
  0x3e   :  { %463 = vmatprep.subr.mxu1 %v175_v10  ;;  %476 = vmatprep.mubr.msk.f32.mxu0 %vm607_vm2, %v606_v21  ;;  %p579_p9 = por %p578_p8, %p577_p7 }
  0x3f   :  { %464 = vmatpush3.msra.mxu1 %v175_v10 }
  0x40   :  { %465 = vmatprep.subr.mxu1 %v174_v11  ;;  %p580_p10 = pnand %p579_p9, %p573_p6 }
  0x41   :  { %466 = vmatpush3.msra.mxu1 %v174_v11 }
  0x42   :  { %467 = vmatprep.subr.mxu1 %v173_v12 }
  0x43   :  { %468 = vmatpush3.msra.mxu1 %v173_v12 }
  0x44   :  { %469 = vmatprep.subr.mxu1 %v172_v13 }
  0x45   :  { %470 = vmatpush3.msra.mxu1 %v172_v13 }
  0xfc   :  { %v454_v15 = vpop.f32.mrf.mxu0 }
  0xfd   :  { %v167_v16 = vadd.f32 %v454_v15, %v420_v14 }
  0xfe   :  { %v161_v17 = vpop.f32.mrf.mxu0 }
  0xff   :  { %v162_v18 = vadd.f32 %v420_v14, %v161_v17  ;;  %v171_v20 = vmax.f32 %v167_v16, 0.0 }
 0x101   :  { %v170_v19 = vmax.f32 %v162_v18, 0.0 }
 0x103   :  { %471 = vmatprep.mubr.msk.f32.mxu1 %vm187_vm1, %v170_v19 }
 0x104   :  { %472 = vmatmul.mubr.msk.f32.vlgmr.msra.gmra.mxu1 %vm187_vm1, %v171_v20 }
 0x1c4   :  { %v473_v23 = vpop.f32.mrf.mxu1 }
 0x1c5   :  { %v266_v24 = vadd.f32 %v473_v23, %v423_v22 }
 0x1c6   :  { %v260_v25 = vpop.f32.mrf.mxu1 }
 0x1c7   :  { %v291_v26 = vrot.slane %v266_v24, 4  ;;  %v298_v27 = vmul.f32 %v266_v24, %v266_v24  ;;  %v261_v28 = vadd.f32 %v423_v22, %v260_v25 }
 0x1c9   :  { %v292_v29 = vadd.f32 %v291_v26, %v266_v24  ;;  %v299_v30 = vrot.slane %v298_v27, 4  ;;  %v269_v31 = vrot.slane %v261_v28, 4  ;;  %v277_v32 = vmul.f32 %v261_v28, %v261_v28 }
 0x1cb   :  { %v293_v33 = vrot.slane %v292_v29, 2  ;;  %v300_v34 = vadd.f32 %v299_v30, %v298_v27  ;;  %v270_v35 = vadd.f32 %v269_v31, %v261_v28  ;;  %v278_v36 = vrot.slane %v277_v32, 4 }
 0x1cd   :  { %v294_v37 = vadd.f32 %v293_v33, %v292_v29  ;;  %v301_v38 = vrot.slane %v300_v34, 2  ;;  %v271_v39 = vrot.slane %v270_v35, 2  ;;  %v279_v40 = vadd.f32 %v278_v36, %v277_v32 }
 0x1cf   :  { %v295_v41 = vrot.slane %v294_v37, 1  ;;  %v302_v42 = vadd.f32 %v301_v38, %v300_v34  ;;  %v272_v43 = vadd.f32 %v271_v39, %v270_v35  ;;  %v280_v44 = vrot.slane %v279_v40, 2 }
 0x1d1   :  { %v296_v45 = vadd.f32 %v295_v41, %v294_v37  ;;  %v303_v46 = vrot.slane %v302_v42, 1  ;;  %v273_v47 = vrot.slane %v272_v43, 1  ;;  %v281_v48 = vadd.f32 %v280_v44, %v279_v40 }
 0x1d3   :  { %v297_v49 = vmul.f32 0.125, %v296_v45  ;;  %v304_v50 = vadd.f32 %v303_v46, %v302_v42  ;;  %v274_v51 = vadd.f32 %v273_v47, %v272_v43  ;;  %v282_v52 = vrot.slane %v281_v48, 1 }
 0x1d5   :  { %v305_v53 = vmul.f32 0.125, %v304_v50  ;;  %v306_v54 = vmul.f32 %v297_v49, %v297_v49  ;;  %v276_v55 = vmul.f32 0.125, %v274_v51  ;;  %v283_v56 = vadd.f32 %v282_v52, %v281_v48 }
 0x1d6   :  { %v308_v63 = vsub.f32 %v266_v24, %v297_v49 }
 0x1d7   :  { %v307_v57 = vsub.f32 %v305_v53, %v306_v54  ;;  %v285_v58 = vmul.f32 %v276_v55, %v276_v55  ;;  %v284_v59 = vmul.f32 0.125, %v283_v56  ;;  %v287_v2 = vsub.f32 %v261_v28, %v276_v55 }
 0x1d9   :  { %v309_v60 = vadd.f32 1e-05, %v307_v57  ;;  %v286_v61 = vsub.f32 %v284_v59, %v285_v58 }
 0x1db   :  { %488 = vrsqrt.f32 %v309_v60  ;;  %v288_v62 = vadd.f32 1e-05, %v286_v61 }
 0x1dd   :  { %490 = vrsqrt.f32 %v288_v62 }
 0x1e8   :  { %v489_v0 = vpop.eup %488 }
 0x1e9   :  { %v311_v1 = vmul.f32 %v489_v0, %v308_v63 }
 0x1ea   :  { %v491_v3 = vpop.eup %490 }
 0x1eb   :  { %475 = vmatpush3.xpose.msra.mxu0 %v311_v1  ;;  %v290_v4 = vmul.f32 %v491_v3, %v287_v2 }
 0x1ed   :  { %v383_v5 = vmul.f32 %v311_v1, %v290_v4 }
 0x1ee   :  { %477 = vmatmul.mubr.f32.vlgmr.msra.gmra.mxu0 %v290_v4 }
 0x1ef   :  { %384 = vadd.xlane.f32.xlu0 %v383_v5 }
 0x278   :  { %v385_v11 = vpop.xlane.xlu0 %384 }
 0x279   :  { %v386_v12 = vmul.f32 0.125, %v385_v11 }
 0x27b   :  { %v392_v13 = vmul.f32 %v386_v12, %v386_v12 }
 0x2ae   :  { %v378_v6 = vpop.f32.mrf.mxu0 }
 0x2af   :  { %v382_v7 = vmul.f32 0.125, %v378_v6 }
 0x2b0   :  { %v478_v8 = vpop.f32.mrf.mxu0 }
 0x2b1   :  { %v387_v9 = vmul.f32 %v382_v7, %v382_v7 }
 0x2b3   :  { %v389_v10 = vsel %vm388_vm3, %v387_v9, 0.0 }
 0x2b4   :  { %390 = vadd.xlane.f32.xlu0 %v389_v10 }
 0x33d   :  { %v391_v14 = vpop.xlane.xlu0 %390 }
 0x33e   :  { %v393_v15 = vsub.f32 %v391_v14, %v392_v13 }
 0x340   :  { %v394_v16 = vrot.slane %v393_v15, 4 }
 0x342   :  { %v395_v17 = vadd.f32 %v394_v16, %v393_v15 }
 0x344   :  { %v396_v18 = vrot.slane %v395_v17, 2 }
 0x346   :  { %v397_v19 = vadd.f32 %v396_v18, %v395_v17 }
 0x348   :  { %v398_v20 = vrot.slane %v397_v19, 1 }
 0x34a   :  { %v399_v21 = vadd.f32 %v398_v20, %v397_v19 }
 0x34c   :  { %v400_v22 = vmul.f32 0.005, %v399_v21 }
 0x34e   :  { %402 = vst.msk [vmem:[#allocation10] sm:$0x1] %vm401_vm4, %v400_v22 }
 0x34f   :  { %583 = shalt.err (!%p580_p10)
}
 0x350   :  { %412 = dma.vmem_to_hbm [thread:$0]  %s410_s5, 16, %s673_s6, [#allocation4]  }
 0x351   :  { %598 = dma.done.wait [#allocation4], 16  }
 0x352   :  { %599 = vsyncadd [#allocation4], 4294967280 }
 0x353   :  { %416 = vsyncpa [#allocation3], 1 }
 0x354   :  { %417 = vsyncpa [#allocation6], 1 }
 0x355   :  { %418 = vsyncpa [#allocation9], 1 }
 0x356   :  { %419 = vsyncpa [#allocation4], 1 }

</bundles_post_ra>
